<compile_context>
chip_gen: v6e
topology: v6e:2x2x1
jax: 0.10.0
libtpu: 0.0.40
codegen_flags: <defaults>
</compile_context>

<pallas_src>
import jax
import jax.numpy as jnp
from jax.experimental import pallas as pl
from jax.experimental.pallas import tpu as pltpu

LANE = 128


def _round_up(x, m):
    return ((x + m - 1) // m) * m


def _largest_divisor_tile(extent, cap):
    """Largest multiple of LANE that divides `extent` (a multiple of LANE), <= cap."""
    t = max(LANE, min(cap, extent))
    t -= t % LANE
    while extent % t:
        t -= LANE
    return t


def _pad_nodes(n):
    """Pad node count to 128; large graphs to a multiple of 512 so the
    aggregation never falls back to 128-row tiles."""
    n_p = _round_up(max(n, 1), LANE)
    if n_p > 512:
        n_p = _round_up(n_p, 512)
    return n_p


def _vmem_limit_bytes():
    """Per-generation VMEM budget: ~96 MiB on v5e/v6e (128 MiB physical),
    ~48 MiB on v7x (64 MiB per TensorCore)."""
    cap = 64 * 1024 * 1024  # conservative fallback (v7x per-TC size)
    try:
        info = pltpu.get_tpu_info()
        cap = int(getattr(info, "vmem_capacity_bytes", cap))
    except Exception:
        pass
    return max(min(cap * 3 // 4, 96 * 1024 * 1024), 32 * 1024 * 1024)


def _plan_agg_tiles(n_p, num_rels, d_in_p, d_out_p, budget):
    """Pick (dst tile, reduction tile) for the aggregation kernel."""
    td = _largest_divisor_tile(n_p, 1024)
    # keep >= 2 dst tiles when possible so v7x's 2 TensorCores both get work
    if n_p // td < 2 and n_p > LANE:
        td = _largest_divisor_tile(n_p, n_p // 2)
    k_p = num_rels * n_p
    ts = _largest_divisor_tile(k_p, 512)

    def footprint(td_, ts_):
        return (2 * td_ * ts_ * 2            # adjacency blocks (bf16, x2 buffers)
                + 2 * ts_ * d_out_p * 2      # HT blocks
                + 2 * td_ * d_in_p * 2       # h dst blocks
                + 2 * d_in_p * d_out_p * 2   # W_self
                + td_ * d_out_p * 4)         # f32 accumulator scratch

    while footprint(td, ts) > budget and ts > LANE:
        ts = _largest_divisor_tile(k_p, ts - LANE)
    while footprint(td, ts) > budget and td > LANE:
        td = _largest_divisor_tile(n_p, td - LANE)
    return td, ts


# ----------------------------------------------------------------------------
# Kernel 1: per-relation feature transform
#   ht[r * n_p + u, :] = h[u] @ W_r        (bf16 out, f32 MXU accumulation)
# grid = (relations, node row tiles), both "parallel".
# ----------------------------------------------------------------------------
def _transform_kernel(h_ref, w_ref, ht_ref):
    ht_ref[...] = jnp.dot(h_ref[...], w_ref[0],
                          preferred_element_type=jnp.float32).astype(ht_ref.dtype)


def pallas_transform(h, w_rel, vmem_limit):
    n_p, d_in_p = h.shape
    num_rels, _, d_out_p = w_rel.shape
    tm = _largest_divisor_tile(n_p, 512)
    n_tiles = n_p // tm
    return pl.pallas_call(
        _transform_kernel,
        out_shape=jax.ShapeDtypeStruct((num_rels * n_p, d_out_p), jnp.bfloat16),
        grid=(num_rels, n_tiles),
        in_specs=[pl.BlockSpec((tm, d_in_p), lambda r, i: (i, 0)),
                  pl.BlockSpec((1, d_in_p, d_out_p), lambda r, i: (r, 0, 0))],
        out_specs=pl.BlockSpec((tm, d_out_p),
                               lambda r, i, n_tiles=n_tiles: (r * n_tiles + i, 0)),
        compiler_params=pltpu.CompilerParams(
            dimension_semantics=("parallel", "parallel"),
            vmem_limit_bytes=vmem_limit),
    )(h, w_rel)


# ----------------------------------------------------------------------------
# Kernel 2: neighbor aggregation + self loop + relu (single K-concat MXU dot)
#   new_h[dst_tile] = relu( h_dst @ W_self
#                           + sum_{k tiles} A_cat[dst_tile, k] @ HT_cat[k] )
# grid = (dst tiles [parallel], K-reduction tiles [arbitrary]).
# ----------------------------------------------------------------------------
def _agg_kernel(adj_ref, ht_ref, h_dst_ref, w_self_ref, out_ref, acc_ref):
    j = pl.program_id(1)

    @pl.when(j == 0)
    def _():
        # self-loop term (curr_emb = h_dst @ W_self); W_self stays in VMEM
        acc_ref[...] = jnp.dot(h_dst_ref[...], w_self_ref[...],
                               preferred_element_type=jnp.float32)

    # neighbor messages: one (td, ts) @ (ts, d_out_p) dot over the
    # (relation, src)-concatenated contraction axis, accumulated in place.
    acc_ref[...] += jnp.dot(adj_ref[...], ht_ref[...],
                            preferred_element_type=jnp.float32)

    @pl.when(j == pl.num_programs(1) - 1)
    def _():
        # SumAggregator + F.relu (bias=None in RGCNBasisLayer), lane-dense store
        out_ref[...] = jnp.maximum(acc_ref[...], 0.0).astype(out_ref.dtype)


def pallas_aggregate(adj_cat, ht, h, w_self, vmem_limit):
    n_p, k_p = adj_cat.shape
    d_in_p = h.shape[1]
    d_out_p = w_self.shape[1]
    num_rels = k_p // n_p
    td, ts = _plan_agg_tiles(n_p, num_rels, d_in_p, d_out_p, vmem_limit)
    return pl.pallas_call(
        _agg_kernel,
        out_shape=jax.ShapeDtypeStruct((n_p, d_out_p), jnp.bfloat16),
        grid=(n_p // td, k_p // ts),
        in_specs=[pl.BlockSpec((td, ts), lambda i, j: (i, j)),
                  pl.BlockSpec((ts, d_out_p), lambda i, j: (j, 0)),
                  pl.BlockSpec((td, d_in_p), lambda i, j: (i, 0)),
                  pl.BlockSpec((d_in_p, d_out_p), lambda i, j: (0, 0))],
        out_specs=pl.BlockSpec((td, d_out_p), lambda i, j: (i, 0)),
        scratch_shapes=[pltpu.VMEM((td, d_out_p), jnp.float32)],
        compiler_params=pltpu.CompilerParams(
            dimension_semantics=("parallel", "arbitrary"),
            vmem_limit_bytes=vmem_limit),
    )(adj_cat, ht, h, w_self)


# ----------------------------------------------------------------------------
# Parameter init (deterministic xavier_uniform with relu gain, like the module)
# ----------------------------------------------------------------------------
def xavier_uniform(key, shape, gain):
    if len(shape) == 2:
        fan_in, fan_out = shape[0], shape[1]
    else:  # (num_bases, inp, out) -> follow torch's fan convention
        receptive = 1
        for d in shape[2:]:
            receptive *= d
        fan_in, fan_out = shape[1] * receptive, shape[0] * receptive
    a = gain * jnp.sqrt(6.0 / (fan_in + fan_out))
    return jax.random.uniform(key, shape, jnp.float32, minval=-a, maxval=a)


def init_rgcn_layer(key, inp_dim, out_dim, num_rels, num_bases):
    gain = jnp.sqrt(2.0)  # calculate_gain('relu')
    k1, k2, k3 = jax.random.split(key, 3)
    weight = xavier_uniform(k1, (num_bases, inp_dim, out_dim), gain)
    w_comp = xavier_uniform(k2, (num_rels, num_bases), gain)
    w_self = xavier_uniform(k3, (inp_dim, out_dim), gain)
    return dict(weight=weight, w_comp=w_comp, self_loop_weight=w_self)


# ----------------------------------------------------------------------------
# RGCN forward (tiny basis combination / padding in XLA, hot paths in Pallas)
# ----------------------------------------------------------------------------
def rgcn_layer_forward(h_pad, adj_cat, params, vmem_limit):
    weight = params['weight']              # (num_bases, d_in, d_out)
    w_comp = params['w_comp']              # (num_rels, num_bases)
    w_self = params['self_loop_weight']    # (d_in, d_out)
    num_bases, d_in, d_out = weight.shape
    num_rels = w_comp.shape[0]

    n_p, d_in_p = h_pad.shape
    d_out_p = _round_up(d_out, LANE)

    # Basis combination: (R, B) @ (B, Din*Dout) — too tiny for a pallas_call.
    w_rel = jnp.matmul(w_comp, weight.reshape(num_bases, d_in * d_out))
    w_rel = w_rel.reshape(num_rels, d_in, d_out)

    # Zero-pad to 128-lane-aligned shapes, cast once to bf16 for the MXU.
    w_rel_p = jnp.zeros((num_rels, d_in_p, d_out_p), jnp.float32)
    w_rel_p = w_rel_p.at[:, :d_in, :d_out].set(w_rel).astype(jnp.bfloat16)
    w_self_p = jnp.zeros((d_in_p, d_out_p), jnp.float32)
    w_self_p = w_self_p.at[:d_in, :d_out].set(w_self).astype(jnp.bfloat16)

    # TODO(synk): for very large graphs fuse the transform into the aggregation
    # kernel (compute h_src @ W on the fly with W resident in VMEM) to drop the
    # HT HBM round trip entirely.
    ht = pallas_transform(h_pad, w_rel_p, vmem_limit)          # (R*n_p, d_out_p)
    return pallas_aggregate(adj_cat, ht, h_pad, w_self_p, vmem_limit)


def rgcn_forward(node_feat, edge_src, edge_dst, edge_type, layer_params,
                 num_nodes, num_rels):
    n, d_in = node_feat.shape
    n_p = _pad_nodes(n)
    d_in_p = _round_up(d_in, LANE)
    vmem_limit = _vmem_limit_bytes()

    # Zero-padded node features, bf16 for the MXU (f32 accumulation inside).
    h = jnp.zeros((n_p, d_in_p), jnp.bfloat16)
    h = h.at[:n, :d_in].set(node_feat.astype(jnp.bfloat16))

    # K-concatenated dense adjacency, built directly in bf16:
    #   adj_cat[v, r * n_p + u] = #(edges u -> v of relation r)
    # Exact for multiplicities <= 256 (bf16 integer range).
    # TODO(synk): replace with a dst-sorted CSR / segment-sum aggregation
    # (PrefetchScalarGridSpec) for large graphs; dense is O(R*N^2) bytes.
    cols = edge_type.astype(jnp.int32) * n_p + edge_src.astype(jnp.int32)
    adj_cat = jnp.zeros((n_p, num_rels * n_p), jnp.bfloat16)
    adj_cat = adj_cat.at[edge_dst.astype(jnp.int32), cols].add(1.0)

    for params in layer_params:
        h = rgcn_layer_forward(h, adj_cat, params, vmem_limit)

    d_out = layer_params[-1]['self_loop_weight'].shape[1]
    node_ids = jnp.arange(num_nodes, dtype=jnp.int32)
    # mirrors (nf.layers[-1].data['h'], nf.layer_parent_nid(-1))
    return h[:num_nodes, :d_out].astype(jnp.float32), node_ids


# Pure-JAX f32 reference of the same dense-RGCN math (for a sanity check).
def rgcn_reference(node_feat, edge_src, edge_dst, edge_type, layer_params,
                   num_nodes, num_rels):
    adj = jnp.zeros((num_rels, num_nodes, num_nodes), jnp.float32)
    adj = adj.at[edge_type, edge_dst, edge_src].add(1.0)
    h = node_feat.astype(jnp.float32)
    for params in layer_params:
        weight, w_comp, w_self = (params['weight'], params['w_comp'],
                                  params['self_loop_weight'])
        nb, di, do = weight.shape
        w_rel = jnp.matmul(w_comp, weight.reshape(nb, di * do))
        w_rel = w_rel.reshape(num_rels, di, do)
        ht = jnp.einsum('ui,rio->ruo', h, w_rel)
        msg = jnp.einsum('rvu,ruo->vo', adj, ht)
        h = jax.nn.relu(msg + h @ w_self)
    return h


# ----------------------------------------------------------------------------
if __name__ == "__main__":
    # parameters implied by the module __init__
    parameter = dict(
        embed_dim=16,          # inp_dim
        rgcn_embed_dim=16,     # emb_dim / attn_rel_emb_dim
        num_relations=4,
        num_bases=2,
        num_gcn_layers=2,
        dropout=0.0,
        edge_dropout=0.0,
        neighborhood_sample_rate=8,
        has_attn=False,
        gnn_agg_type='sum',
        device=None,
    )

    N, E = 8, 24
    key = jax.random.PRNGKey(0)
    k_feat, k_src, k_dst, k_type, k_l0, k_l1 = jax.random.split(key, 6)

    node_feat = jax.random.normal(k_feat, (N, parameter['embed_dim']),
                                  jnp.float32)
    edge_src = jax.random.randint(k_src, (E,), 0, N)
    edge_dst = jax.random.randint(k_dst, (E,), 0, N)
    edge_type = jax.random.randint(k_type, (E,), 0,
                                   parameter['num_relations'])

    # build_model(): input layer (inp_dim -> emb_dim) + (num_gcn_layers-1) hidden
    layer_params = [
        init_rgcn_layer(k_l0, parameter['embed_dim'],
                        parameter['rgcn_embed_dim'],
                        parameter['num_relations'], parameter['num_bases']),
    ]
    for _ in range(parameter['num_gcn_layers'] - 1):
        layer_params.append(
            init_rgcn_layer(k_l1, parameter['rgcn_embed_dim'],
                            parameter['rgcn_embed_dim'],
                            parameter['num_relations'],
                            parameter['num_bases']))

    h_out, node_ids = rgcn_forward(node_feat, edge_src, edge_dst, edge_type,
                                   layer_params, N,
                                   parameter['num_relations'])
    jax.block_until_ready((h_out, node_ids))

    h_ref = rgcn_reference(node_feat, edge_src, edge_dst, edge_type,
                           layer_params, N, parameter['num_relations'])

    assert h_out.shape == (N, parameter['rgcn_embed_dim'])
    assert node_ids.shape == (N,)
    # bf16 compute vs f32 reference -> loose tolerance
    assert jnp.allclose(h_out, h_ref, rtol=1e-1, atol=1e-1), \
        float(jnp.max(jnp.abs(h_out - h_ref)))
    print("KERNEL_OK")
</pallas_src>

<mosaic_0001>
module attributes {stable_mosaic.version = 11 : i64} {
  func.func @_transform_kernel(%arg0: i32, %arg1: i32, %arg2: memref<128x128xbf16, #tpu.memory_space<vmem>>, %arg3: memref<1x128x128xbf16, #tpu.memory_space<vmem>>, %arg4: memref<128x128xbf16, #tpu.memory_space<vmem>>) attributes {dimension_semantics = [#tpu.dimension_semantics<parallel>, #tpu.dimension_semantics<parallel>], iteration_bounds = array<i64: 4, 1>, scalar_prefetch = 0 : i64, scratch_operands = 0 : i64, tpu.core_type = #tpu.core_type<tc>, window_params = [{transform_indices = @transform_0, window_bounds = array<i64: 128, 128>}, {transform_indices = @transform_1, window_bounds = array<i64: 1, 128, 128>}, {transform_indices = @transform_2, window_bounds = array<i64: 128, 128>}]} {
    %c0 = arith.constant 0 : index
    %c0_0 = arith.constant 0 : index
    %0 = vector.load %arg2[%c0, %c0_0] : memref<128x128xbf16, #tpu.memory_space<vmem>>, vector<128x128xbf16>
    %c0_1 = arith.constant 0 : index
    %c0_2 = arith.constant 0 : index
    %c0_3 = arith.constant 0 : index
    %1 = vector.load %arg3[%c0_1, %c0_2, %c0_3] : memref<1x128x128xbf16, #tpu.memory_space<vmem>>, vector<1x128x128xbf16>
    %2 = vector.shape_cast %1 : vector<1x128x128xbf16> to vector<128x128xbf16>
    %cst = arith.constant dense<0.000000e+00> : vector<128x128xf32>
    %3 = tpu.matmul %0, %2, %cst {dimension_numbers = #tpu.dot_dimension_numbers<[1], [0], [0], [1], [0, 0, 1, 1], [], []>} : vector<128x128xbf16>, vector<128x128xbf16>, vector<128x128xf32> -> vector<128x128xf32>
    %4 = arith.truncf %3 : vector<128x128xf32> to vector<128x128xbf16>
    %c0_4 = arith.constant 0 : index
    %c0_5 = arith.constant 0 : index
    %5 = vector.load %arg4[%c0_4, %c0_5] : memref<128x128xbf16, #tpu.memory_space<vmem>>, vector<128x128xbf16>
    tpu.vector_store %arg4[%c0_4, %c0_5], %4 {strides = array<i32>} : memref<128x128xbf16, #tpu.memory_space<vmem>>, vector<128x128xbf16>,
    return
  }
  func.func @transform_0(%arg0: i32, %arg1: i32) -> (i32, i32) {
    %c0_i32 = arith.constant 0 : i32
    %c0_i32_0 = arith.constant 0 : i32
    return %arg1, %c0_i32 : i32, i32
  }
  func.func @transform_1(%arg0: i32, %arg1: i32) -> (i32, i32, i32) {
    %c0_i32 = arith.constant 0 : i32
    %c0_i32_0 = arith.constant 0 : i32
    %c0_i32_1 = arith.constant 0 : i32
    return %arg0, %c0_i32, %c0_i32_0 : i32, i32, i32
  }
  func.func @transform_2(%arg0: i32, %arg1: i32) -> (i32, i32) {
    %c1_i32 = arith.constant 1 : i32
    %0 = arith.muli %arg0, %c1_i32 : i32
    %1 = arith.addi %0, %arg1 : i32
    %c0_i32 = arith.constant 0 : i32
    %c0_i32_0 = arith.constant 0 : i32
    return %1, %c0_i32 : i32, i32
  }
}

</mosaic_0001>

<bundles_post_ra>
// kernel: tpu_custom_call.1
= control target key start
LH: loop header
LB: loop body
LE: loop exit
PB: predicated region body
PF: predicated region fallthrough
CT: control target
= control target key end

     0   :  { %7 = vsyncpa [#allocation3], 0  ;;  %s1251_s0 = inlined_call_operand.hbm [shape: bf16[128,128], index: 0, kind: input, shape index: {}]   ;;  %s1252_s1 = inlined_call_operand.hbm [shape: bf16[4,128,128], index: 1, kind: input, shape index: {}]   ;;  %s1253_s2 = inlined_call_operand.hbm [shape: bf16[512,128], index: 2, kind: output, shape index: {}]  }
   0x1   :  { %8 = vsyncpa [#allocation6], 0 }
   0x2   :  { %10 = vsyncpa [#allocation6 + $0x1], 0 }
   0x3   :  { %11 = vsyncpa [#allocation4], 0 }
   0x4   :  { %13 = vsyncpa [#allocation4 + $0x1], 0  ;;  %s1052_s9 = smov 0   ;;  %s1054_s10 = smov 0  }
   0x5   :  { %s1056_s11 = smov 0   ;;  %s1058_s12 = smov 0  }
   0x6   :  { %s1060_s13 = smov 0   ;;  %s1062_s14 = smov 0  }
   0x7 LB: > { %s619_s15 = sadd.s32 4294967295, %s1028_s14   ;;  %s620_s16 = sadd.s32 4294967294, %s1028_s14   ;;  %s1028_s14 = sphi %s1062_s14, %s19_s14   ;;  %s1024_s13 = sphi %s1060_s13, %s1272_s13   ;;  %s1020_s12 = sphi %s1058_s12, %s1271_s12   ;;  %s1016_s11 = sphi %s1056_s11, %s1270_s11   ;;  %s1012_s10 = sphi %s1054_s10, %s1269_s10   ;;  %s1008_s9 = sphi %s1052_s9, %s1268_s9  }
   0x8   : > { %p77_p0 = scmp.ne.s32.totalorder %s1012_s10, %s1008_s9  ;;  %p1086_p1 = scmp.eq.s32.totalorder %s619_s15, 0 }
   0x9   : > { %p1090_p2 = scmp.eq.s32.totalorder %s619_s15, 3  ;;  %p109_p3 = scmp.eq.s32.totalorder %s620_s16, 3 }
   0xa   : > { %p1096_p4 = por %p1086_p1, %p77_p0  ;;  %p621_p5 = scmp.ge.s32.totalorder %s1028_s14, 1 }
   0xb   : > { %p1101_p6 = por %p109_p3, %p77_p0  ;;  %p116_p7 = scmp.lt.s32.totalorder %s1028_s14, 5 }
   0xc   : > { %s1030_s22 = smov [#allocation2]   ;;  %s31_s25 = sadd.s32 1, %s1024_s13 }
   0xd   : > { %s1259_s20 = scalar_select %p1101_p6, 1, 0 }
   0xe   : > { %p1106_p8 = pnand %p621_p5, %p116_p7  ;;  %s131_s23 = sshll.u32 %s1030_s22, 4  ;;  %s132_s23 = int_to_ptr.vmem [resolvable:$true] %s131_s23 }
   0xf   : > { %s901_s26 = scalar_lea.vmem %s132_s23, 1024  ;;  %p909_p3 = scmp.lt.s32.totalorder %s132_s23, %s132_s23 }
  0x10   : > { %p805_p9 = pneg %p1106_p8  ;;  %p902_p12 = scmp.ne.s32.totalorder %s132_s23, %s901_s26 }
  0x11   : > { %p910_p5 = scmp.lt.s32.totalorder %s901_s26, %s901_s26 }
  0x12   : > { %p1114_p10 = pnand %p805_p9, %p1086_p1 }
  0x13   : > { %p911_p7 = por %p910_p5, %p909_p3 }
  0x14   : > { %p892_p11 = pneg %p1114_p10 }
  0x16   : > { %p904_p13 = pnand %p902_p12, %p892_p11 }
  0x18   : > { %p905_p0 = pneg %p904_p13 }
  0x1a   : > { %p912_p6 = pnand %p911_p7, %p905_p0 }
  0x1c   : > { %915 = shalt.err (!%p912_p6)
}
  0x1d   : > { %s1254_s27 = smov 64   ;;  %s1032_s28 = smov 4  }
  0x1e   : > { %808 = dma.hbm_to_vmem [thread:$0]  (!%p1114_p10), %s1251_s0, 1024, %s132_s23, [#allocation3], %s1254_s27, %s1254_s27, %s1032_s28  }
  0x1f   : > { %p33_p6 = scmp.ge.s32.totalorder %s31_s25, 4  ;;  %s64_s3 = sadd.s32 1, %s1016_s11 }
  0x20   : > { %p71_p9 = scmp.ne.s32.totalorder %s1016_s11, %s1012_s10  ;;  %p72_p11 = scmp.eq.s32.totalorder %s1028_s14, 0 }
  0x21   : > { %s1274_s25 = smov (%p33_p6, %s31_s25), 0  ;;  %p818_p0 = scmp.lt.s32.totalorder %s1028_s14, 4 }
  0x22   : > { %p1135_p12 = por %p72_p11, %p71_p9  ;;  %p1141_p13 = por %p1090_p2, %p71_p9 }
  0x23   : > { %s61_s6 = ssub.s32 %s1024_s13, %s1274_s25  ;;  %s145_s7 = sand.u32 1, %s1016_s11  }
  0x24   : > { %s1263_s5 = scalar_select %p1141_p13, 1, 0 }
  0x25   : > { %p62_p10 = scmp.eq.s32.totalorder %s61_s6, 0  ;;  %s624_s8 = sshll.u32 %s145_s7, 6 }
  0x26   : > { %s668_s16 = sshll.u32 %s1024_s13, 10  ;;  %s149_s26 = scalar_lea.vmem [#allocation5], %s624_s8 }
  0x27   : > { %s1150_s15 = scalar_select %p62_p10, %s1016_s11, %s64_s3  }
  0x28   : > { %s155_s24 = scalar_lea.hbm %s1252_s1, %s668_s16  ;;  %s156_s29 = sshll.u32 %s149_s26, 4  ;;  %s157_s29 = int_to_ptr.vmem [resolvable:$true] %s156_s29 }
  0x29   : > { %p1158_p2 = pnand %p818_p0, %p1135_p12  ;;  %s146_s30 = scalar_lea.sflag [#allocation6], %s145_s7 }
  0x2a   : > { %s929_s6 = scalar_lea.vmem %s157_s29, 1024  ;;  %s1033_s3 = smov [#allocation5]  }
  0x2b   : > { %p918_p3 = pneg %p1158_p2  ;;  %p930_p5 = scmp.ne.s32.totalorder %s157_s29, %s929_s6 }
  0x2c   : > { %s934_s27 = sshll.u32 %s1033_s3, 4  ;;  %s935_s27 = int_to_ptr.vmem [resolvable:$false] %s934_s27 }
  0x2d   : > { %p932_p7 = pnand %p930_p5, %p918_p3  ;;  %s936_s16 = scalar_lea.vmem %s935_s27, 2048 }
  0x2e   : > { %p937_p9 = scmp.lt.s32.totalorder %s157_s29, %s935_s27  ;;  %p938_p11 = scmp.lt.s32.totalorder %s936_s16, %s929_s6 }
  0x2f   : > { %p933_p6 = pneg %p932_p7 }
  0x30   : > { %p939_p10 = por %p938_p11, %p937_p9 }
  0x32   : > { %p940_p13 = pnand %p939_p10, %p933_p6 }
  0x34   : > { %943 = shalt.err (!%p940_p13)
}
  0x35   : > { %s1265_s4 = smov 64   ;;  %168 = sbr.rel (%p1106_p8) target bundleno = 319 (0x13f), region = 28 }
  0x36   : > { %812 = dma.hbm_to_vmem [thread:$0]  (!%p1158_p2), %s155_s24, 1024, %s157_s29, %s146_s30, %s1265_s4, %s1265_s4, %s1032_s28  }
  0x3a   : > { %995 = dma.done.wait (%p1086_p1), [#allocation3], 1024  }
  0x3b   : > { %997 = vsyncadd (%p1086_p1), [#allocation3], 4294966272  ;;  %s1176_s27 = sand.u32 1, %s1012_s10  }
  0x3c   : > { %s629_s7 = sshll.u32 %s1176_s27, 6  ;;  %s175_s8 = scalar_lea.sflag [#allocation6], %s1176_s27 }
  0x3d   : > { %s1182_s28 = scalar_lea.vmem [#allocation5], %s629_s7 }
  0x3e   : > { %999 = dma.done.wait (%p1096_p4), %s175_s8, 1024  }
  0x3f   : > { %1001 = vsyncadd (%p1096_p4), %s175_s8, 4294966272  ;;  %v874_v0 = vld [vmem:[%s1182_s28 + $0x38] sm:$0xff]   ;;  %v875_v1 = vld [vmem:[%s1182_s28 + $0x30] sm:$0xff]   ;;  %s198_s17 = scalar_lea.vmem [#allocation7], %s629_s7  ;;  %s685_s21 = sshll.u32 %s1020_s12, 10 }
  0x40   : > { %749 = vmatprep.subr.bf16.mxu0 %v874_v0  ;;  %781 = vmatprep.subr.bf16.mxu1 %v874_v0  ;;  %v876_v2 = vld [vmem:[%s1182_s28 + $0x28] sm:$0xff]   ;;  %v877_v3 = vld [vmem:[%s1182_s28 + $0x20] sm:$0xff]   ;;  %v878_v6 = vld [vmem:[%s1182_s28 + $0x18] sm:$0xff]   ;;  %s523_s19 = sshll.u32 %s198_s17, 4  ;;  %s1204_s24 = scalar_lea.hbm %s1253_s2, %s685_s21  ;;  %s1199_s19 = int_to_ptr.vmem [resolvable:$true] %s523_s19 }
  0x41   : > { %750 = vmatpush3.bf16.msra.mxu0 %v874_v0  ;;  %789 = vmatpush3.bf16.msra.mxu1 %v874_v0  ;;  %v882_v4 = vld [vmem:[#allocation2] sm:$0xff]   ;;  %v879_v7 = vld [vmem:[%s1182_s28 + $0x10] sm:$0xff]   ;;  %v880_v8 = vld [vmem:[%s1182_s28 + $0x8] sm:$0xff]   ;;  %s509_s12 = scalar_lea.sflag [#allocation4], %s1176_s27  ;;  %s944_s26 = scalar_lea.vmem %s1199_s19, 1024 }
  0x42   : > { %751 = vmatprep.subr.bf16.mxu0 %v875_v1  ;;  %782 = vmatprep.subr.bf16.mxu1 %v875_v1  ;;  %v883_v5 = vld [vmem:[#allocation2 + $0x20] sm:$0xff]   ;;  %v884_v10 = vld [vmem:[#allocation2 + $0x8] sm:$0xff]   ;;  %v886_v12 = vld [vmem:[#allocation2 + $0x10] sm:$0xff]   ;;  %p945_p1 = scmp.ne.s32.totalorder %s1199_s19, %s944_s26  ;;  %p1266_p4 = scmp.ne.s32.totalorder %s1263_s5, 0 }
  0x43   : > { %765 = vmatprep.mubr.bf16.mxu0 %v882_v4  ;;  %773 = vmatprep.mubr.bf16.mxu1 %v883_v5  ;;  %v881_v9 = vld [vmem:[%s1182_s28] sm:$0xff]   ;;  %v885_v11 = vld [vmem:[#allocation2 + $0x28] sm:$0xff]   ;;  %v887_v13 = vld [vmem:[#allocation2 + $0x30] sm:$0xff]   ;;  %s1034_s29 = smov [#allocation7]  }
  0x44   : > { %v888_v14 = vld [vmem:[#allocation2 + $0x18] sm:$0xff]   ;;  %p946_p8 = pnand %p945_p1, %p1266_p4  ;;  %s948_s18 = sshll.u32 %s1034_s29, 4  ;;  %s949_s18 = int_to_ptr.vmem [resolvable:$false] %s948_s18 }
  0x45   : > { %752 = vmatpush3.bf16.msra.mxu0 %v875_v1  ;;  %790 = vmatpush3.bf16.msra.mxu1 %v875_v1  ;;  %v889_v15 = vld [vmem:[#allocation2 + $0x38] sm:$0xff]   ;;  %s950_s30 = scalar_lea.vmem %s949_s18, 2048  ;;  %p951_p13 = scmp.lt.s32.totalorder %s1199_s19, %s949_s18 }
  0x46   : > { %753 = vmatprep.subr.bf16.mxu0 %v876_v2  ;;  %783 = vmatprep.subr.bf16.mxu1 %v876_v2  ;;  %p947_p12 = pneg %p946_p8  ;;  %p952_p0 = scmp.lt.s32.totalorder %s950_s30, %s944_s26 }
  0x48   : > { %p953_p2 = por %p952_p0, %p951_p13 }
  0x49   : > { %754 = vmatpush3.bf16.msra.mxu0 %v876_v2  ;;  %791 = vmatpush3.bf16.msra.mxu1 %v876_v2 }
  0x4a   : > { %755 = vmatprep.subr.bf16.mxu0 %v877_v3  ;;  %784 = vmatprep.subr.bf16.mxu1 %v877_v3  ;;  %p954_p3 = pnand %p953_p2, %p947_p12 }
  0x4d   : > { %756 = vmatpush3.bf16.msra.mxu0 %v877_v3  ;;  %792 = vmatpush3.bf16.msra.mxu1 %v877_v3 }
  0x4e   : > { %757 = vmatprep.subr.bf16.mxu0 %v878_v6  ;;  %785 = vmatprep.subr.bf16.mxu1 %v878_v6 }
  0x51   : > { %758 = vmatpush3.bf16.msra.mxu0 %v878_v6  ;;  %793 = vmatpush3.bf16.msra.mxu1 %v878_v6 }
  0x52   : > { %759 = vmatprep.subr.bf16.mxu0 %v879_v7  ;;  %786 = vmatprep.subr.bf16.mxu1 %v879_v7 }
  0x55   : > { %760 = vmatpush3.bf16.msra.mxu0 %v879_v7  ;;  %794 = vmatpush3.bf16.msra.mxu1 %v879_v7 }
  0x56   : > { %761 = vmatprep.subr.bf16.mxu0 %v880_v8  ;;  %787 = vmatprep.subr.bf16.mxu1 %v880_v8 }
  0x59   : > { %762 = vmatpush3.bf16.msra.mxu0 %v880_v8  ;;  %795 = vmatpush3.bf16.msra.mxu1 %v880_v8 }
  0x5a   : > { %763 = vmatprep.subr.bf16.mxu0 %v881_v9  ;;  %788 = vmatprep.subr.bf16.mxu1 %v881_v9 }
  0x5d   : > { %764 = vmatpush3.bf16.msra.mxu0 %v881_v9  ;;  %796 = vmatpush3.bf16.msra.mxu1 %v881_v9 }
  0x60   : > { %766 = vmatmul.mubr.bf16.vlgmr.msra.gmra.mxu0 %v884_v10  ;;  %774 = vmatmul.mubr.bf16.vlgmr.msra.gmra.mxu1 %v885_v11 }
  0x61   : > { %769 = vmatprep.mubr.bf16.mxu0 %v886_v12  ;;  %777 = vmatprep.mubr.bf16.mxu1 %v887_v13 }
  0x68   : > { %770 = vmatmul.mubr.bf16.gmra.mxu0 %v888_v14  ;;  %778 = vmatmul.mubr.bf16.gmra.mxu1 %v889_v15 }
 0x120   : > { %v767_v16 = vpop.f32.mrf.mxu0  ;;  %v775_v17 = vpop.f32.mrf.mxu1 }
 0x122   : > { %v365_v18 = vpop.f32.mrf.mxu0  ;;  %v397_v19 = vpop.f32.mrf.mxu1 }
 0x124   : > { %v768_v20 = vpop.f32.mrf.mxu0  ;;  %v776_v21 = vpop.f32.mrf.mxu1 }
 0x125   : > { %v694_v22 = vpack.c.bf16 %v768_v20, %v767_v16  ;;  %v714_v23 = vpack.c.bf16 %v776_v21, %v775_v17 }
 0x126   : > { %v368_v24 = vpop.f32.mrf.mxu0  ;;  %v400_v25 = vpop.f32.mrf.mxu1 }
 0x127   : > { %726 = vst [vmem:[%s198_s17 + $0x8] sm:$0xff] %v694_v22   ;;  %730 = vst [vmem:[%s198_s17 + $0x28] sm:$0xff] %v714_v23   ;;  %v689_v26 = vpack.c.bf16 %v368_v24, %v365_v18  ;;  %v709_v27 = vpack.c.bf16 %v400_v25, %v397_v19 }
 0x128   : > { %v771_v28 = vpop.f32.mrf.mxu0  ;;  %v779_v29 = vpop.f32.mrf.mxu1 }
 0x129   : > { %690 = vst [vmem:[%s198_s17] sm:$0xff] %v689_v26   ;;  %729 = vst [vmem:[%s198_s17 + $0x20] sm:$0xff] %v709_v27  }
 0x12a   : > { %v381_v30 = vpop.f32.mrf.mxu0  ;;  %v413_v31 = vpop.f32.mrf.mxu1 }
 0x12c   : > { %v772_v32 = vpop.f32.mrf.mxu0  ;;  %v780_v33 = vpop.f32.mrf.mxu1 }
 0x12d   : > { %v704_v34 = vpack.c.bf16 %v772_v32, %v771_v28  ;;  %v724_v35 = vpack.c.bf16 %v780_v33, %v779_v29 }
 0x12e   : > { %v384_v36 = vpop.f32.mrf.mxu0  ;;  %v416_v37 = vpop.f32.mrf.mxu1 }
 0x12f   : > { %728 = vst [vmem:[%s198_s17 + $0x18] sm:$0xff] %v704_v34   ;;  %732 = vst [vmem:[%s198_s17 + $0x38] sm:$0xff] %v724_v35   ;;  %v699_v38 = vpack.c.bf16 %v384_v36, %v381_v30  ;;  %v719_v39 = vpack.c.bf16 %v416_v37, %v413_v31 }
 0x131   : > { %727 = vst [vmem:[%s198_s17 + $0x10] sm:$0xff] %v699_v38   ;;  %731 = vst [vmem:[%s198_s17 + $0x30] sm:$0xff] %v719_v39  }
 0x132   : > { %957 = shalt.err (!%p954_p3)
}
 0x133   : > { %s958_s6 = scalar_lea.hbm %s1204_s24, 1024  ;;  %s962_s4 = scalar_lea.hbm %s1253_s2, 4096 }
 0x134   : > { %p959_p5 = scmp.ne.s32.totalorder %s1204_s24, %s958_s6  ;;  %p963_p9 = scmp.lt.s32.totalorder %s1204_s24, %s1253_s2 }
 0x135   : > { %p964_p11 = scmp.lt.s32.totalorder %s962_s4, %s958_s6 }
 0x136   : > { %p960_p7 = pnand %p959_p5, %p1266_p4 }
 0x137   : > { %p965_p10 = por %p964_p11, %p963_p9 }
 0x138   : > { %p961_p6 = pneg %p960_p7 }
 0x13a   : > { %p966_p1 = pnand %p965_p10, %p961_p6 }
 0x13c   : > { %969 = shalt.err (!%p966_p1)
}
 0x13d   : > { %s1035_s28 = smov 64   ;;  %s1036_s17 = smov 4  }
 0x13e   : > { %803 = dma.vmem_to_hbm [thread:$0]  (%p1266_p4), %s1199_s19, 1024, %s1204_s24, %s509_s12, %s1035_s28, %s1035_s28, %s1036_s17  }
 0x13f PF: > { %p820_p8 = scmp.ge.s32.totalorder %s1028_s14, 2  ;;  %s538_s21 = sand.u32 1, %s1008_s9  }
 0x140   : > { %p1267_p12 = scmp.ne.s32.totalorder %s1259_s20, 0  ;;  %s539_s22 = scalar_lea.sflag [#allocation4], %s538_s21 }
 0x142   : > { %p814_p13 = pnand %p820_p8, %p1267_p12 }
 0x144   : > { %p815_p0 = pneg %p814_p13 }
 0x146   : > { %1003 = dma.done.wait (%p815_p0), %s539_s22, 1024  }
 0x147   : > { %1005 = vsyncadd (%p815_p0), %s539_s22, 4294966272  ;;  %s19_s14 = sadd.s32 1, %s1028_s14   ;;  %s1268_s9 = smov %s1012_s10 }
 0x148   : > { %p16_p2 = scmp.ge.s32.totalorder %s19_s14, 6   ;;  %s1269_s10 = smov %s1016_s11 }
 0x149   : > { %s1270_s11 = smov %s1150_s15  ;;  %s1271_s12 = smov %s1024_s13 }
 0x14a   : > { %s1272_s13 = smov %s1274_s25  ;;  %18 = sbr.rel (!%p16_p2) target bundleno = 7 (0x7), region = 79 }
 0x14f   :  { %544 = vsyncpa [#allocation3], 1 }
 0x150   :  { %546 = vsyncpa [#allocation3 + $0x1], 1 }
 0x151   :  { %547 = vsyncpa [#allocation6], 1 }
 0x152   :  { %549 = vsyncpa [#allocation6 + $0x1], 1 }
 0x153   :  { %550 = vsyncpa [#allocation4], 1 }
 0x154   :  { %552 = vsyncpa [#allocation4 + $0x1], 1 }

</bundles_post_ra>
